<compile_context>
chip_gen: v7x
topology: tpu7x:2x2x1
jax: 0.10.0
libtpu: 0.0.40
codegen_flags: <defaults>
</compile_context>

<pallas_src>
import jax
import jax.numpy as jnp
from jax.experimental import pallas as pl
from jax.experimental.pallas import tpu as pltpu

_LANE = 128
_TINY_FLOPS = 1 << 18  # below this, pallas_call overhead dwarfs the matmul


def _round_up(v, m):
    return ((v + m - 1) // m) * m


def _vmem_config():
    """(tile budget bytes, scoped vmem_limit_bytes) per TPU generation."""
    try:
        cap = pltpu.get_tpu_info().vmem_capacity_bytes
    except Exception:
        cap = 64 << 20
    if cap >= (128 << 20):
        return 40 << 20, 64 << 20   # v5e / v6e: 128 MiB physical, raise scoped limit
    return 20 << 20, 32 << 20       # v7x-class: 64 MiB physical, 32 MiB scoped


def _pick_row_tile(dim, granule, max_waste=0.125, max_tile=1024):
    """Largest tile (multiple of `granule`) whose zero-padding waste is acceptable."""
    dim = max(int(dim), 1)
    cands = [t for t in (512, 384, 256, 128, 64, 32, 16, 8) if t % granule == 0]
    exact = _round_up(dim, granule)
    if exact <= max_tile:
        cands.append(exact)
    best_t, best_w = None, None
    for t in sorted(set(cands), reverse=True):
        waste = (_round_up(dim, t) - dim) / dim
        if waste <= max_waste:
            return t
        if best_w is None or waste < best_w:
            best_t, best_w = t, waste
    return best_t


def _pick_divisor_tile(padded_dim, cap):
    """Largest multiple of 128 dividing padded_dim (itself a 128-multiple), <= cap."""
    cap = max(_LANE, (cap // _LANE) * _LANE)
    t = min(cap, padded_dim)
    t = max((t // _LANE) * _LANE, _LANE)
    while padded_dim % t:
        t -= _LANE
    return max(t, _LANE)


def _linear_kernel(x_ref, w_ref, o_ref):
    # Whole K panel resident in VMEM: one MXU contraction per (i, j) tile.
    o_ref[...] = jnp.dot(
        x_ref[...], w_ref[...], preferred_element_type=jnp.float32
    ).astype(o_ref.dtype)


def _linear_acc_kernel(x_ref, w_ref, o_ref):
    # K split across the last ("arbitrary") grid axis: accumulate directly into
    # the resident f32 output block — no VMEM scratch, no finalize copy.
    @pl.when(pl.program_id(2) == 0)
    def _init():
        o_ref[...] = jnp.zeros_like(o_ref)

    o_ref[...] += jnp.dot(
        x_ref[...], w_ref[...], preferred_element_type=jnp.float32
    )


def prepare_weight(weight, mxu_dtype=jnp.bfloat16):
    """Hoistable weight prep: (N, K) -> transposed/padded/cast (Kp, Np), 128-aligned."""
    n, k = weight.shape
    w_t = weight.T                                   # (K, N): lane-dense N output
    kp, np_ = _round_up(k, _LANE), _round_up(n, _LANE)
    if (kp, np_) != (k, n):
        w_t = jnp.pad(w_t, ((0, kp - k), (0, np_ - n)))
    if mxu_dtype is not None:
        w_t = w_t.astype(mxu_dtype)
    return w_t


def _pallas_linear(x, w_t_pad, n_out, vmem_budget_bytes=None):
    m, k = x.shape
    kp, np_ = w_t_pad.shape
    op_dtype = w_t_pad.dtype
    op_bytes = jnp.dtype(op_dtype).itemsize

    budget, vmem_limit = _vmem_config()
    if vmem_budget_bytes is not None:
        budget = vmem_budget_bytes

    # Sublane granule: bf16 packs 2 rows / sublane -> use 16; f32 -> 8.
    sub_m = 16 if op_bytes < 4 else 8
    tm = _pick_row_tile(m, sub_m)
    mp = _round_up(m, tm)

    tn = _pick_divisor_tile(np_, 512)
    # v7x megacore: give both TensorCores blocks when the row-tile grid is 1.
    if mp // tm == 1 and np_ // tn < 2 and np_ >= 2 * _LANE:
        tn = _pick_divisor_tile(np_, np_ // 2)

    out_tile_bytes = 2 * tm * tn * 4
    in_bytes_per_k = 2 * (tm + tn) * op_bytes        # double-buffered x + w panels
    tk_cap = max((budget - out_tile_bytes) // in_bytes_per_k, _LANE)

    if x.dtype != op_dtype:
        x = x.astype(op_dtype)
    if (mp, kp) != (m, k):
        x = jnp.pad(x, ((0, mp - m), (0, kp - k)))   # zero K-pad: no effect on sum

    cost = pl.CostEstimate(
        flops=2 * m * n_out * k,
        transcendentals=0,
        bytes_accessed=(mp * kp + kp * np_) * op_bytes + mp * np_ * 4,
    )

    if kp <= tk_cap:
        # Full K panel fits VMEM: 2-D grid, j innermost so the x block index
        # (i, 0) is unchanged across j and its HBM->VMEM DMA is skipped.
        y = pl.pallas_call(
            _linear_kernel,
            out_shape=jax.ShapeDtypeStruct((mp, np_), jnp.float32),
            grid=(mp // tm, np_ // tn),
            in_specs=[
                pl.BlockSpec((tm, kp), lambda i, j: (i, 0)),
                pl.BlockSpec((kp, tn), lambda i, j: (0, j)),
            ],
            out_specs=pl.BlockSpec((tm, tn), lambda i, j: (i, j)),
            compiler_params=pltpu.CompilerParams(
                dimension_semantics=("parallel", "parallel"),
                vmem_limit_bytes=vmem_limit,
            ),
            cost_estimate=cost,
        )(x, w_t_pad)
    else:
        tk = _pick_divisor_tile(kp, tk_cap)
        y = pl.pallas_call(
            _linear_acc_kernel,
            out_shape=jax.ShapeDtypeStruct((mp, np_), jnp.float32),
            grid=(mp // tm, np_ // tn, kp // tk),
            in_specs=[
                pl.BlockSpec((tm, tk), lambda i, j, kk: (i, kk)),
                pl.BlockSpec((tk, tn), lambda i, j, kk: (kk, j)),
            ],
            out_specs=pl.BlockSpec((tm, tn), lambda i, j, kk: (i, j)),
            compiler_params=pltpu.CompilerParams(
                dimension_semantics=("parallel", "parallel", "arbitrary"),
                vmem_limit_bytes=vmem_limit,
            ),
            cost_estimate=cost,
        )(x, w_t_pad)

    if (mp, np_) != (m, n_out):
        y = y[:m, :n_out]
    return y


def make_kakuritsu_linear(weight, p=0.5, mxu_dtype=jnp.bfloat16):
    """Build a forward fn for myKakuritsu_Linear_Obj with the weight prepared once.

    weight: (out_features, in_features) float32 (PyTorch layout)
    mxu_dtype: bfloat16 (fast, f32 accumulation) or None for pure-f32 operands.
    """
    # TODO(synk): stochastic "Kakuritsu" part (p) defined only in the missing extension.
    del p
    n_out, k_in = weight.shape
    w_t_pad = prepare_weight(weight, mxu_dtype)

    def forward(x, vmem_budget_bytes=None):
        m, k = x.shape
        assert k == k_in, "in_features mismatch"
        if 2 * m * n_out * k < _TINY_FLOPS:
            # Tiny-layer fast path: pad/transpose/pallas overhead would dominate.
            return jnp.dot(x, weight.T, precision=jax.lax.Precision.HIGHEST).astype(x.dtype)
        y = _pallas_linear(x, w_t_pad, n_out, vmem_budget_bytes=vmem_budget_bytes)
        return y.astype(x.dtype)

    return forward


def kakuritsu_linear(x, weight, p=0.5, mxu_dtype=jnp.bfloat16, vmem_budget_bytes=None):
    """One-shot convenience wrapper (weight prep NOT hoisted across calls)."""
    return make_kakuritsu_linear(weight, p, mxu_dtype)(x, vmem_budget_bytes)


if __name__ == "__main__":
    key = jax.random.PRNGKey(0)
    kx1, kw1, kx2, kw2 = jax.random.split(key, 4)

    # Case 1: tiny layer like the module's toy use (fast path, exact f32).
    b1, in1, out1 = 8, 32, 16
    x1 = jax.random.normal(kx1, (b1, in1), dtype=jnp.float32)
    w1 = jax.random.uniform(kw1, (out1, in1), dtype=jnp.float32, minval=-0.1, maxval=0.1)
    y1 = jax.block_until_ready(kakuritsu_linear(x1, w1, p=0.5))
    r1 = jnp.dot(x1, w1.T, precision=jax.lax.Precision.HIGHEST)
    assert y1.shape == (b1, out1)
    assert jnp.allclose(y1, r1, atol=1e-4, rtol=1e-4)

    # Case 2: moderate layer exercising the Pallas kernel (full-K, 2-D grid).
    b2, in2, out2 = 192, 384, 160
    x2 = jax.random.normal(kx2, (b2, in2), dtype=jnp.float32)
    w2 = jax.random.uniform(kw2, (out2, in2), dtype=jnp.float32, minval=-0.1, maxval=0.1)
    r2 = jnp.dot(x2, w2.T, precision=jax.lax.Precision.HIGHEST)

    fwd_bf16 = make_kakuritsu_linear(w2, p=0.5, mxu_dtype=jnp.bfloat16)
    y2 = jax.block_until_ready(fwd_bf16(x2))
    assert y2.shape == (b2, out2) and y2.dtype == jnp.float32
    assert jnp.allclose(y2, r2, atol=5e-2, rtol=5e-2)          # bf16 operands, f32 accum

    fwd_f32 = make_kakuritsu_linear(w2, p=0.5, mxu_dtype=None)
    y2f = jax.block_until_ready(fwd_f32(x2))
    assert jnp.allclose(y2f, r2, atol=1e-4, rtol=1e-4)         # f32 parity path

    # Case 3: force the K-split path (3-D grid, accumulate directly into o_ref).
    y3f = jax.block_until_ready(fwd_f32(x2, vmem_budget_bytes=512 * 1024))
    assert jnp.allclose(y3f, r2, atol=1e-4, rtol=1e-4)
    y3b = jax.block_until_ready(fwd_bf16(x2, vmem_budget_bytes=512 * 1024))
    assert jnp.allclose(y3b, r2, atol=5e-2, rtol=5e-2)

    print("KERNEL_OK")
</pallas_src>

<mosaic_0001>
module attributes {stable_mosaic.version = 11 : i64} {
  func.func @_linear_kernel(%arg0: i32, %arg1: i32, %arg2: memref<192x384xbf16, #tpu.memory_space<vmem>>, %arg3: memref<384x128xbf16, #tpu.memory_space<vmem>>, %arg4: memref<192x128xf32, #tpu.memory_space<vmem>>) attributes {dimension_semantics = [#tpu.dimension_semantics<parallel>, #tpu.dimension_semantics<parallel>], iteration_bounds = array<i64: 1, 2>, scalar_prefetch = 0 : i64, scratch_operands = 0 : i64, tpu.core_type = #tpu.core_type<tc>, window_params = [{transform_indices = @transform_0, window_bounds = array<i64: 192, 384>}, {transform_indices = @transform_1, window_bounds = array<i64: 384, 128>}, {transform_indices = @transform_2, window_bounds = array<i64: 192, 128>}]} {
    %c0 = arith.constant 0 : index
    %c0_0 = arith.constant 0 : index
    %0 = vector.load %arg2[%c0, %c0_0] : memref<192x384xbf16, #tpu.memory_space<vmem>>, vector<192x384xbf16>
    %c0_1 = arith.constant 0 : index
    %c0_2 = arith.constant 0 : index
    %1 = vector.load %arg3[%c0_1, %c0_2] : memref<384x128xbf16, #tpu.memory_space<vmem>>, vector<384x128xbf16>
    %cst = arith.constant dense<0.000000e+00> : vector<192x128xf32>
    %2 = tpu.matmul %0, %1, %cst {dimension_numbers = #tpu.dot_dimension_numbers<[1], [0], [0], [1], [0, 0, 1, 1], [], []>} : vector<192x384xbf16>, vector<384x128xbf16>, vector<192x128xf32> -> vector<192x128xf32>
    %c0_3 = arith.constant 0 : index
    %c0_4 = arith.constant 0 : index
    %3 = vector.load %arg4[%c0_3, %c0_4] : memref<192x128xf32, #tpu.memory_space<vmem>>, vector<192x128xf32>
    tpu.vector_store %arg4[%c0_3, %c0_4], %2 {strides = array<i32>} : memref<192x128xf32, #tpu.memory_space<vmem>>, vector<192x128xf32>,
    return
  }
  func.func @transform_0(%arg0: i32, %arg1: i32) -> (i32, i32) {
    %c0_i32 = arith.constant 0 : i32
    %c0_i32_0 = arith.constant 0 : i32
    return %arg0, %c0_i32 : i32, i32
  }
  func.func @transform_1(%arg0: i32, %arg1: i32) -> (i32, i32) {
    %c0_i32 = arith.constant 0 : i32
    %c0_i32_0 = arith.constant 0 : i32
    return %c0_i32, %arg1 : i32, i32
  }
  func.func @transform_2(%arg0: i32, %arg1: i32) -> (i32, i32) {
    %c0_i32 = arith.constant 0 : i32
    return %arg0, %arg1 : i32, i32
  }
}

</mosaic_0001>

<bundles_post_ra>
// kernel: tpu_custom_call.1
= control target key start
LH: loop header
LB: loop body
LE: loop exit
PB: predicated region body
PF: predicated region fallthrough
CT: control target
= control target key end

     0   :  { %7 = vsyncpa [#allocation3], 0  ;;  %s1858_s0 = inlined_call_operand.hbm [shape: bf16[192,384], index: 0, kind: input, shape index: {}]   ;;  %s1859_s1 = inlined_call_operand.hbm [shape: bf16[384,256], index: 1, kind: input, shape index: {}]   ;;  %s1860_s2 = inlined_call_operand.hbm [shape: f32[192,256], index: 2, kind: output, shape index: {}]  }
   0x1   :  { %8 = vsyncpa [#allocation6], 0 }
   0x2   :  { %10 = vsyncpa [#allocation6 + $0x1], 0 }
   0x3   :  { %11 = vsyncpa [#allocation4], 0 }
   0x4   :  { %13 = vsyncpa [#allocation4 + $0x1], 0  ;;  %s1575_s9 = smov 0   ;;  %s1577_s10 = smov 0  }
   0x5   :  { %s1579_s11 = smov 0   ;;  %s1581_s12 = smov 0  }
   0x6   :  { %s1583_s13 = smov 0   ;;  %s1585_s14 = smov 0  }
   0x7 LB: > { %s1029_s15 = sadd.s32 4294967295, %s1547_s14   ;;  %s1030_s16 = sadd.s32 4294967294, %s1547_s14   ;;  %s1547_s14 = sphi %s1585_s14, %s19_s14   ;;  %s1543_s13 = sphi %s1583_s13, %s1886_s13   ;;  %s1539_s12 = sphi %s1581_s12, %s1885_s12   ;;  %s1535_s11 = sphi %s1579_s11, %s1884_s11   ;;  %s1531_s10 = sphi %s1577_s10, %s1883_s10   ;;  %s1527_s9 = sphi %s1575_s9, %s1882_s9  }
   0x8   : > { %p71_p0 = scmp.ne.s32.totalorder %s1535_s11, %s1531_s10  ;;  %p72_p1 = scmp.eq.s32.totalorder %s1547_s14, 0 }
   0x9   : > { %p77_p2 = scmp.ne.s32.totalorder %s1531_s10, %s1527_s9  ;;  %p1612_p3 = scmp.eq.s32.totalorder %s1029_s15, 0 }
   0xa   : > { %p1616_p4 = por %p72_p1, %p71_p0  ;;  %p103_p5 = scmp.eq.s32.totalorder %s1029_s15, 1 }
   0xb   : > { %s1867_s17 = scalar_select %p1612_p3, 1, 0 }
   0xc   : > { %p1622_p6 = por %p1612_p3, %p77_p2  ;;  %p109_p7 = scmp.eq.s32.totalorder %s1030_s16, 1 }
   0xd   : > { %p1626_p8 = por %p103_p5, %p71_p0  ;;  %p1031_p9 = scmp.ge.s32.totalorder %s1547_s14, 1 }
   0xe   : > { %s1869_s19 = scalar_select %p1622_p6, 1, 0 }
   0xf   : > { %s1870_s20 = scalar_select %p1626_p8, 1, 0 }
  0x10   : > { %p1631_p10 = por %p109_p7, %p77_p2  ;;  %p116_p11 = scmp.lt.s32.totalorder %s1547_s14, 3 }
  0x11   : > { %s1549_s23 = smov [#allocation2]   ;;  %p1271_p1 = scmp.lt.s32.totalorder %s1547_s14, 2 }
  0x12   : > { %s1871_s21 = scalar_select %p1631_p10, 1, 0 }
  0x13   : > { %p1636_p12 = pnand %p1031_p9, %p116_p11  ;;  %s132_s24 = sshll.u32 %s1549_s23, 4  ;;  %s1640_s24 = int_to_ptr.vmem [resolvable:$true] %s132_s24 }
  0x14   : > { %p1654_p2 = pnand %p1271_p1, %p1616_p4  ;;  %s28_s27 = sadd.s32 1, %s1543_s13 }
  0x15   : > { %s1872_s22 = scalar_select %p1636_p12, 1, 0 }
  0x16   : > { %p1258_p13 = pneg %p1636_p12  ;;  %s1403_s30 = scalar_lea.hbm %s1858_s0, 4608 }
  0x17   : > { %s1874_s26 = scalar_select %p1654_p2, 1, 0 }
  0x18   : > { %p1648_p5 = pnand %p1258_p13, %p1612_p3  ;;  %p1404_p7 = scmp.ne.s32.totalorder %s1858_s0, %s1403_s30 }
  0x19   : > { %p1410_p4 = scmp.lt.u32.totalorder %s1403_s30, %s1858_s0 }
  0x1a   : > { %p1405_p9 = pneg %p1648_p5 }
  0x1c   : > { %p1406_p11 = pnand %p1405_p9, %p1404_p7 }
  0x1e   : > { %p1407_p13 = pneg %p1406_p11 }
  0x20   : > { %p1412_p1 = pnand %p1410_p4, %p1407_p13 }
  0x22   : > { %1415 = shalt.err (!%p1412_p1)
}
  0x23   : > { %s1416_s7 = scalar_lea.vmem %s1640_s24, 4608  ;;  %p1424_p6 = scmp.lt.s32.totalorder %s1640_s24, %s1640_s24 }
  0x24   : > { %p1417_p0 = scmp.ne.s32.totalorder %s1640_s24, %s1416_s7  ;;  %p1425_p3 = scmp.lt.s32.totalorder %s1416_s7, %s1416_s7 }
  0x26   : > { %p1419_p10 = pnand %p1417_p0, %p1405_p9  ;;  %p1426_p12 = por %p1425_p3, %p1424_p6 }
  0x28   : > { %p1420_p8 = pneg %p1419_p10 }
  0x2a   : > { %p1427_p2 = pnand %p1426_p12, %p1420_p8 }
  0x2c   : > { %1430 = shalt.err (!%p1427_p2)
}
  0x2d   : > { %s1550_s8 = smov 192   ;;  %s1551_s15 = smov 12  }
  0x2e   : > { %1261 = dma.hbm_to_vmem [thread:$0]  (!%p1648_p5), %s1858_s0, 4608, %s1640_s24, [#allocation3], %s1550_s8, %s1550_s8, %s1551_s15  }
  0x2f   : > { %p29_p10 = scmp.ge.s32.totalorder %s28_s27, 2  ;;  %s64_s23 = sadd.s32 1, %s1535_s11 }
  0x30   : > { %s146_s28 = sand.u32 1, %s1535_s11   ;;  %s1034_s3 = sshll.u32 %s1543_s13, 6 }
  0x31   : > { %s1888_s27 = smov (%p29_p10, %s28_s27), 0  ;;  %s1248_s29 = smul.u32 192, %s146_s28 }
  0x32   : > { %s61_s30 = ssub.s32 %s1543_s13, %s1888_s27  ;;  %s1690_s25 = scalar_lea.hbm %s1859_s1, %s1034_s3 }
  0x33   : > { %p62_p3 = scmp.eq.s32.totalorder %s61_s30, 0  ;;  %s150_s24 = scalar_lea.vmem [#allocation5], %s1248_s29 }
  0x34   : > { %s156_s6 = sshll.u32 %s150_s24, 4  ;;  %s1697_s8 = scalar_lea.sflag [#allocation6], %s146_s28  ;;  %s1695_s6 = int_to_ptr.vmem [resolvable:$true] %s156_s6 }
  0x35   : > { %s1693_s7 = scalar_select %p62_p3, %s1535_s11, %s64_s23  }
  0x36   : > { %s1431_s15 = scalar_lea.hbm %s1690_s25, 3072  ;;  %p1875_p8 = scmp.ne.s32.totalorder %s1874_s26, 0 }
  0x37   : > { %p1432_p6 = scmp.ne.s32.totalorder %s1690_s25, %s1431_s15  ;;  %s1436_s30 = scalar_lea.hbm %s1859_s1, 6144 }
  0x38   : > { %p1433_p12 = pneg %p1875_p8  ;;  %p1437_p2 = scmp.lt.u32.totalorder %s1690_s25, %s1859_s1 }
  0x39   : > { %p1438_p7 = scmp.lt.u32.totalorder %s1436_s30, %s1431_s15  ;;  %p1440_p11 = scmp.lt.u32.totalorder %s1431_s15, %s1690_s25 }
  0x3a   : > { %p1434_p0 = pnand %p1433_p12, %p1432_p6 }
  0x3b   : > { %p1439_p9 = por %p1438_p7, %p1437_p2 }
  0x3c   : > { %p1435_p5 = pneg %p1434_p0 }
  0x3d   : > { %p1441_p13 = por %p1440_p11, %p1439_p9 }
  0x3f   : > { %p1442_p4 = pnand %p1441_p13, %p1435_p5 }
  0x41   : > { %1445 = shalt.err (!%p1442_p4)
}
  0x42   : > { %s1446_s23 = scalar_lea.vmem %s1695_s6, 3072  ;;  %s1552_s28 = smov [#allocation5]  }
  0x43   : > { %p1447_p1 = scmp.ne.s32.totalorder %s1695_s6, %s1446_s23  ;;  %s1451_s4 = sshll.u32 %s1552_s28, 4  ;;  %s1452_s4 = int_to_ptr.vmem [resolvable:$false] %s1451_s4 }
  0x44   : > { %s1453_s5 = scalar_lea.vmem %s1452_s4, 6144  ;;  %p1454_p6 = scmp.lt.s32.totalorder %s1695_s6, %s1452_s4 }
  0x45   : > { %p1449_p10 = pnand %p1447_p1, %p1433_p12  ;;  %p1455_p0 = scmp.lt.s32.totalorder %s1453_s5, %s1446_s23 }
  0x47   : > { %p1450_p3 = pneg %p1449_p10  ;;  %p1456_p2 = por %p1455_p0, %p1454_p6 }
  0x49   : > { %p1457_p7 = pnand %p1456_p2, %p1450_p3 }
  0x4b   : > { %1460 = shalt.err (!%p1457_p7)
}
  0x4c   : > { %s1553_s24 = smov 128   ;;  %s1554_s15 = smov 64  }
  0x4d   : > { %s1555_s16 = smov 4   ;;  %p1876_p12 = scmp.ne.s32.totalorder %s1872_s22, 0 }
  0x4e   : > { %1265 = dma.hbm_to_vmem [thread:$0]  (!%p1875_p8), %s1690_s25, 3072, %s1695_s6, %s1697_s8, %s1553_s24, %s1554_s15, %s1555_s16  }
  0x4f   : > { %168 = sbr.rel (%p1876_p12) target bundleno = 448 (0x1c0), region = 28  ;;  %p1877_p5 = scmp.ne.s32.totalorder (!%p1876_p12), %s1867_s17, 0 }
  0x56   : > { %1514 = dma.done.wait (%p1877_p5), [#allocation3], 4608  }
  0x57   : > { %1516 = vsyncadd (%p1877_p5), [#allocation3], 4294962688  ;;  %s1732_s18 = sand.u32 1, %s1531_s10   ;;  %p1878_p8 = scmp.ne.s32.totalorder %s1869_s19, 0 }
  0x58   : > { %s1249_s30 = smul.u32 192, %s1732_s18  ;;  %s175_s29 = scalar_lea.sflag [#allocation6], %s1732_s18 }
  0x5a   : > { %s1738_s26 = scalar_lea.vmem [#allocation5], %s1249_s30 }
  0x5b   : > { %1518 = dma.done.wait (%p1878_p8), %s175_s29, 3072  }
  0x5c   : > { %1520 = vsyncadd (%p1878_p8), %s175_s29, 4294964224  ;;  %v1331_v0 = vld [vmem:[%s1738_s26 + $0x40] sm:$0xff]   ;;  %v1334_v3 = vld [vmem:[%s1738_s26 + $0x48] sm:$0xff]   ;;  %s1770_s17 = scalar_lea.vmem [#allocation7], %s1249_s30  ;;  %s1097_s19 = sshll.u32 %s1539_s12, 7 }
  0x5d   : > { %v1332_v1 = vld [vmem:[%s1738_s26] sm:$0xff]   ;;  %1100 = vmatprep.subr.bf16.mxu0 %v1331_v0  ;;  %v1335_v4 = vld [vmem:[%s1738_s26 + $0x8] sm:$0xff]   ;;  %v1337_v6 = vld [vmem:[%s1738_s26 + $0x50] sm:$0xff]   ;;  %s932_s22 = sshll.u32 %s1770_s17, 4  ;;  %s1804_s8 = scalar_lea.hbm %s1860_s2, %s1097_s19  ;;  %s1806_s22 = int_to_ptr.vmem [resolvable:$true] %s932_s22 }
  0x5e   : > { %v1333_v2 = vld [vmem:[%s1738_s26 + $0x80] sm:$0xff]   ;;  %1101 = vmatpush3.bf16.msra.mxu0 %v1332_v1  ;;  %v1336_v5 = vld [vmem:[%s1738_s26 + $0x88] sm:$0xff]   ;;  %v1338_v7 = vld [vmem:[%s1738_s26 + $0x10] sm:$0xff]   ;;  %s917_s12 = scalar_lea.sflag [#allocation4], %s1732_s18  ;;  %s1461_s3 = scalar_lea.vmem %s1806_s22, 3072 }
  0x5f   : > { %1208 = vmatprep.subr.bf16.mxu1 %v1333_v2  ;;  %1102 = vmatprep.subr.bf16.mxu0 %v1334_v3  ;;  %v1339_v8 = vld [vmem:[%s1738_s26 + $0x90] sm:$0xff]   ;;  %v1340_v9 = vld [vmem:[%s1738_s26 + $0x58] sm:$0xff]   ;;  %v1343_v12 = vld [vmem:[%s1738_s26 + $0x60] sm:$0xff]   ;;  %p1462_p9 = scmp.ne.s32.totalorder %s1806_s22, %s1461_s3  ;;  %p1879_p11 = scmp.ne.s32.totalorder %s1870_s20, 0 }
  0x60   : > { %1209 = vmatpush3.bf16.msra.mxu1 %v1333_v2  ;;  %v1341_v10 = vld [vmem:[%s1738_s26 + $0x18] sm:$0xff]   ;;  %v1345_v13 = vld [vmem:[%s1738_s26 + $0xa0] sm:$0xff]   ;;  %v1346_v15 = vld [vmem:[%s1738_s26 + $0x68] sm:$0xff]   ;;  %s1556_s23 = smov [#allocation7]  }
  0x61   : > { %1210 = vmatprep.subr.bf16.mxu1 %v1336_v5  ;;  %v1342_v11 = vld [vmem:[%s1738_s26 + $0x98] sm:$0xff]   ;;  %v1344_v14 = vld [vmem:[%s1738_s26 + $0x20] sm:$0xff]   ;;  %v1348_v16 = vld [vmem:[%s1738_s26 + $0xa8] sm:$0xff]   ;;  %p1463_p13 = pnand %p1462_p9, %p1879_p11  ;;  %s1465_s28 = sshll.u32 %s1556_s23, 4  ;;  %s1466_s28 = int_to_ptr.vmem [resolvable:$false] %s1465_s28 }
  0x62   : > { %1103 = vmatpush3.bf16.msra.mxu0 %v1335_v4  ;;  %v1347_v17 = vld [vmem:[%s1738_s26 + $0x28] sm:$0xff]   ;;  %v1349_v18 = vld [vmem:[%s1738_s26 + $0x70] sm:$0xff]   ;;  %v1352_v21 = vld [vmem:[%s1738_s26 + $0x78] sm:$0xff]   ;;  %s1467_s4 = scalar_lea.vmem %s1466_s28, 6144  ;;  %p1468_p1 = scmp.lt.s32.totalorder %s1806_s22, %s1466_s28 }
  0x63   : > { %1104 = vmatprep.subr.bf16.mxu0 %v1337_v6  ;;  %v1350_v19 = vld [vmem:[%s1738_s26 + $0x30] sm:$0xff]   ;;  %v1354_v22 = vld [vmem:[%s1738_s26 + $0xb8] sm:$0xff]   ;;  %v1355_v26 = vld [vmem:[#allocation2] ss:$12 sps:$4 sm:$0xff]   ;;  %p1464_p4 = pneg %p1463_p13  ;;  %p1469_p10 = scmp.lt.s32.totalorder %s1467_s4, %s1461_s3 }
  0x64   : > { %1211 = vmatpush3.bf16.msra.mxu1 %v1336_v5  ;;  %v1351_v20 = vld [vmem:[%s1738_s26 + $0xb0] sm:$0xff]   ;;  %v1353_v25 = vld [vmem:[%s1738_s26 + $0x38] sm:$0xff]   ;;  %v1359_v28 = vld [vmem:[#allocation2 + $0x20] ss:$12 sps:$4 sm:$0xff]  }
  0x65   : > { %1212 = vmatprep.subr.bf16.mxu1 %v1339_v8  ;;  %v1357_v23 = vld [vmem:[#allocation2 + $0x4] ss:$12 sps:$4 sm:$0xff]   ;;  %v1358_v24 = vld [vmem:[#allocation2 + $0x8] ss:$12 sps:$4 sm:$0xff]   ;;  %v1368_v35 = vld [vmem:[#allocation2 + $0x4c] ss:$12 sps:$4 sm:$0xff]   ;;  %p1470_p3 = por %p1469_p10, %p1468_p1 }
  0x66   : > { %1105 = vmatpush3.bf16.msra.mxu0 %v1338_v7  ;;  %666 = vmatprep.mubr.bf16.mxu0 %v1357_v23  ;;  %v1360_v27 = vld [vmem:[#allocation2 + $0x1c] ss:$12 sps:$4 sm:$0xff]   ;;  %v1366_v29 = vld [vmem:[#allocation2 + $0x38] ss:$12 sps:$4 sm:$0xff]   ;;  %v1363_v31 = vld [vmem:[#allocation2 + $0x34] ss:$12 sps:$4 sm:$0xff]  }
  0x67   : > { %1106 = vmatprep.subr.bf16.mxu0 %v1340_v9  ;;  %1224 = vmatprep.mubr.bf16.mxu1 %v1358_v24  ;;  %v1362_v30 = vld [vmem:[#allocation2 + $0x18] ss:$12 sps:$4 sm:$0xff]   ;;  %v1367_v32 = vld [vmem:[#allocation2 + $0x50] ss:$12 sps:$4 sm:$0xff]   ;;  %v1374_v33 = vld [vmem:[#allocation2 + $0x68] ss:$12 sps:$4 sm:$0xff]   ;;  %p1471_p6 = pnand %p1470_p3, %p1464_p4 }
  0x68   : > { %1213 = vmatpush3.bf16.msra.mxu1 %v1339_v8  ;;  %v1365_v34 = vld [vmem:[#allocation2 + $0x30] ss:$12 sps:$4 sm:$0xff]   ;;  %v1375_v36 = vld [vmem:[#allocation2 + $0x80] ss:$12 sps:$4 sm:$0xff]   ;;  %v1382_v37 = vld [vmem:[#allocation2 + $0x98] ss:$12 sps:$4 sm:$0xff]  }
  0x69   : > { %1214 = vmatprep.subr.bf16.mxu1 %v1342_v11  ;;  %v1370_v38 = vld [vmem:[#allocation2 + $0x48] ss:$12 sps:$4 sm:$0xff]   ;;  %v1371_v39 = vld [vmem:[#allocation2 + $0x64] ss:$12 sps:$4 sm:$0xff]   ;;  %v1373_v42 = vld [vmem:[#allocation2 + $0x60] ss:$12 sps:$4 sm:$0xff]  }
  0x6a   : > { %1107 = vmatpush3.bf16.msra.mxu0 %v1341_v10  ;;  %v1383_v40 = vld [vmem:[#allocation2 + $0xb0] ss:$12 sps:$4 sm:$0xff]   ;;  %v1390_v41 = vld [vmem:[#allocation2 + $0xc8] ss:$12 sps:$4 sm:$0xff]   ;;  %v1391_v44 = vld [vmem:[#allocation2 + $0xe0] ss:$12 sps:$4 sm:$0xff]  }
  0x6b   : > { %1108 = vmatprep.subr.bf16.mxu0 %v1343_v12  ;;  %v1376_v43 = vld [vmem:[#allocation2 + $0x7c] ss:$12 sps:$4 sm:$0xff]   ;;  %v1398_v45 = vld [vmem:[#allocation2 + $0xf8] ss:$12 sps:$4 sm:$0xff]   ;;  %v1379_v47 = vld [vmem:[#allocation2 + $0x94] ss:$12 sps:$4 sm:$0xff]  }
  0x6c   : > { %1215 = vmatpush3.bf16.msra.mxu1 %v1342_v11  ;;  %v1378_v46 = vld [vmem:[#allocation2 + $0x78] ss:$12 sps:$4 sm:$0xff]   ;;  %v1399_v48 = vld [vmem:[#allocation2 + $0x110] ss:$12 sps:$4 sm:$0xff]   ;;  %v1386_v51 = vld [vmem:[#allocation2 + $0xa8] ss:$12 sps:$4 sm:$0xff]  }
  0x6d   : > { %1216 = vmatprep.subr.bf16.mxu1 %v1345_v13  ;;  %v1381_v49 = vld [vmem:[#allocation2 + $0x90] ss:$12 sps:$4 sm:$0xff]   ;;  %v1384_v50 = vld [vmem:[#allocation2 + $0xac] ss:$12 sps:$4 sm:$0xff]   ;;  %v1395_v56 = vld [vmem:[#allocation2 + $0xf4] ss:$12 sps:$4 sm:$0xff]  }
  0x6e   : > { %1109 = vmatpush3.bf16.msra.mxu0 %v1344_v14  ;;  %v1387_v52 = vld [vmem:[#allocation2 + $0xc4] ss:$12 sps:$4 sm:$0xff]   ;;  %v1389_v53 = vld [vmem:[#allocation2 + $0xc0] ss:$12 sps:$4 sm:$0xff]   ;;  %v1392_v54 = vld [vmem:[#allocation2 + $0xdc] ss:$12 sps:$4 sm:$0xff]  }
  0x6f   : > { %1110 = vmatprep.subr.bf16.mxu0 %v1346_v15  ;;  %v1394_v55 = vld [vmem:[#allocation2 + $0xd8] ss:$12 sps:$4 sm:$0xff]   ;;  %v1397_v57 = vld [vmem:[#allocation2 + $0xf0] ss:$12 sps:$4 sm:$0xff]   ;;  %v1402_v59 = vld [vmem:[#allocation2 + $0x108] ss:$12 sps:$4 sm:$0xff]  }
  0x70   : > { %1217 = vmatpush3.bf16.msra.mxu1 %v1345_v13  ;;  %v1400_v58 = vld [vmem:[#allocation2 + $0x10c] ss:$12 sps:$4 sm:$0xff]  }
  0x71   : > { %1218 = vmatprep.subr.bf16.mxu1 %v1348_v16 }
  0x72   : > { %1111 = vmatpush3.bf16.msra.mxu0 %v1347_v17 }
  0x73   : > { %1112 = vmatprep.subr.bf16.mxu0 %v1349_v18 }
  0x74   : > { %1219 = vmatpush3.bf16.msra.mxu1 %v1348_v16 }
  0x75   : > { %1220 = vmatprep.subr.bf16.mxu1 %v1351_v20 }
  0x76   : > { %1113 = vmatpush3.bf16.msra.mxu0 %v1350_v19 }
  0x77   : > { %1114 = vmatprep.subr.bf16.mxu0 %v1352_v21 }
  0x78   : > { %1221 = vmatpush3.bf16.msra.mxu1 %v1351_v20 }
  0x79   : > { %1222 = vmatprep.subr.bf16.mxu1 %v1354_v22 }
  0x7a   : > { %1115 = vmatpush3.bf16.msra.mxu0 %v1353_v25 }
  0x7c   : > { %1223 = vmatpush3.bf16.msra.mxu1 %v1354_v22 }
  0x7d   : > { %667 = vmatmul.mubr.bf16.vlgmr.msra.gmra.mrb[0].mxu0 %v1355_v26 }
  0x7e   : > { %674 = vmatprep.mubr.bf16.mxu0 %v1360_v27 }
  0x7f   : > { %1225 = vmatmul.mubr.bf16.vlgmr.msra.gmra.mrb[0].mxu1 %v1359_v28 }
  0x80   : > { %1228 = vmatprep.mubr.bf16.mxu1 %v1366_v29 }
  0x85   : > { %675 = vmatmul.mubr.bf16.gmra.mrb[4].mxu0 %v1362_v30 }
  0x86   : > { %682 = vmatprep.mubr.bf16.mxu0 %v1363_v31 }
  0x87   : > { %1229 = vmatmul.mubr.bf16.gmra.mrb[4].mxu1 %v1367_v32 }
  0x88   : > { %1232 = vmatprep.mubr.bf16.mxu1 %v1374_v33 }
  0x8d   : > { %683 = vmatmul.mubr.bf16.gmra.mrb[8].mxu0 %v1365_v34 }
  0x8e   : > { %690 = vmatprep.mubr.bf16.mxu0 %v1368_v35 }
  0x8f   : > { %1233 = vmatmul.mubr.bf16.gmra.mrb[8].mxu1 %v1375_v36 }
  0x90   : > { %1236 = vmatprep.mubr.bf16.mxu1 %v1382_v37 }
  0x95   : > { %691 = vmatmul.mubr.bf16.gmra.mrb[12].mxu0 %v1370_v38 }
  0x96   : > { %698 = vmatprep.mubr.bf16.mxu0 %v1371_v39 }
  0x97   : > { %1237 = vmatmul.mubr.bf16.gmra.mrb[12].mxu1 %v1383_v40 }
  0x98   : > { %1240 = vmatprep.mubr.bf16.mxu1 %v1390_v41 }
  0x9d   : > { %699 = vmatmul.mubr.bf16.gmra.mrb[16].mxu0 %v1373_v42 }
  0x9e   : > { %706 = vmatprep.mubr.bf16.mxu0 %v1376_v43 }
  0x9f   : > { %1241 = vmatmul.mubr.bf16.gmra.mrb[16].mxu1 %v1391_v44 }
  0xa0   : > { %1244 = vmatprep.mubr.bf16.mxu1 %v1398_v45 }
  0xa5   : > { %707 = vmatmul.mubr.bf16.gmra.mrb[20].mxu0 %v1378_v46 }
  0xa6   : > { %714 = vmatprep.mubr.bf16.mxu0 %v1379_v47 }
  0xa7   : > { %1245 = vmatmul.mubr.bf16.gmra.mrb[20].mxu1 %v1399_v48 }
  0xad   : > { %715 = vmatmul.mubr.bf16.gmra.mrb[24].mxu0 %v1381_v49 }
  0xae   : > { %722 = vmatprep.mubr.bf16.mxu0 %v1384_v50 }
  0xb5   : > { %723 = vmatmul.mubr.bf16.gmra.mrb[28].mxu0 %v1386_v51 }
  0xb6   : > { %730 = vmatprep.mubr.bf16.mxu0 %v1387_v52 }
  0xbd   : > { %731 = vmatmul.mubr.bf16.gmra.mrb[32].mxu0 %v1389_v53 }
  0xbe   : > { %738 = vmatprep.mubr.bf16.mxu0 %v1392_v54 }
  0xc5   : > { %739 = vmatmul.mubr.bf16.gmra.mrb[36].mxu0 %v1394_v55 }
  0xc6   : > { %746 = vmatprep.mubr.bf16.mxu0 %v1395_v56 }
  0xcd   : > { %747 = vmatmul.mubr.bf16.gmra.mrb[40].mxu0 %v1397_v57 }
  0xce   : > { %754 = vmatprep.mubr.bf16.mxu0 %v1400_v58 }
  0xd5   : > { %755 = vmatmul.mubr.bf16.gmra.mrb[44].mxu0 %v1402_v59 }
 0x150   : > { %v1116_v60 = vpop.f32.mrb[0].mxu0 }
 0x151   : > { %v1117_v61 = vpop.f32.mrb[1].mxu0 }
 0x152   : > { %v1118_v62 = vadd.f32 %v1117_v61, %v1116_v60  ;;  %v1119_v63 = vpop.f32.mrb[2].mxu0  ;;  %v1226_v0 = vpop.f32.mrb[0].mxu1 }
 0x153   : > { %v1120_v1 = vpop.f32.mrb[3].mxu0  ;;  %v797_v2 = vpop.f32.mrb[1].mxu1 }
 0x154   : > { %v1121_v3 = vadd.f32 %v1120_v1, %v1119_v63  ;;  %v798_v4 = vadd.f32 %v1118_v62, %v797_v2  ;;  %v1227_v5 = vpop.f32.mrb[2].mxu1 }
 0x155   : > { %v800_v6 = vpop.f32.mrb[3].mxu1 }
 0x156   : > { %892 = vst [vmem:[%s1770_s17] sm:$0xff] %v798_v4  ;;  %v801_v7 = vadd.f32 %v1121_v3, %v800_v6 }
 0x158   : > { %893 = vst [vmem:[%s1770_s17 + $0x8] sm:$0xff] %v801_v7  ;;  %v1122_v8 = vpop.f32.mrb[4].mxu0 }
 0x159   : > { %v1123_v9 = vpop.f32.mrb[5].mxu0 }
 0x15a   : > { %v1124_v10 = vadd.f32 %v1123_v9, %v1122_v8  ;;  %v1125_v11 = vpop.f32.mrb[6].mxu0  ;;  %v1230_v12 = vpop.f32.mrb[4].mxu1 }
 0x15b   : > { %v1126_v13 = vpop.f32.mrb[7].mxu0  ;;  %v813_v14 = vpop.f32.mrb[5].mxu1 }
 0x15c   : > { %v806_v15 = vadd.f32 %v1226_v0, %v1124_v10  ;;  %v1127_v16 = vadd.f32 %v1126_v13, %v1125_v11  ;;  %v1231_v17 = vpop.f32.mrb[6].mxu1 }
 0x15d   : > { %v816_v18 = vpop.f32.mrb[7].mxu1 }
 0x15e   : > { %894 = vst [vmem:[%s1770_s17 + $0x10] sm:$0xff] %v806_v15  ;;  %v809_v19 = vadd.f32 %v1227_v5, %v1127_v16 }
 0x160   : > { %895 = vst [vmem:[%s1770_s17 + $0x18] sm:$0xff] %v809_v19  ;;  %v1128_v20 = vpop.f32.mrb[8].mxu0 }
 0x161   : > { %v1129_v21 = vpop.f32.mrb[9].mxu0 }
 0x162   : > { %v1130_v22 = vadd.f32 %v1129_v21, %v1128_v20  ;;  %v1131_v23 = vpop.f32.mrb[10].mxu0  ;;  %v1234_v24 = vpop.f32.mrb[8].mxu1 }
 0x163   : > { %v1132_v25 = vpop.f32.mrb[11].mxu0  ;;  %v829_v26 = vpop.f32.mrb[9].mxu1 }
 0x164   : > { %v1133_v27 = vadd.f32 %v1132_v25, %v1131_v23  ;;  %v814_v28 = vadd.f32 %v1130_v22, %v813_v14  ;;  %v1235_v29 = vpop.f32.mrb[10].mxu1 }
 0x165   : > { %v832_v30 = vpop.f32.mrb[11].mxu1 }
 0x166   : > { %896 = vst [vmem:[%s1770_s17 + $0x20] sm:$0xff] %v814_v28  ;;  %v817_v31 = vadd.f32 %v1133_v27, %v816_v18 }
 0x168   : > { %897 = vst [vmem:[%s1770_s17 + $0x28] sm:$0xff] %v817_v31  ;;  %v1134_v32 = vpop.f32.mrb[12].mxu0 }
 0x169   : > { %v1135_v33 = vpop.f32.mrb[13].mxu0 }
 0x16a   : > { %v1136_v34 = vadd.f32 %v1135_v33, %v1134_v32  ;;  %v1137_v35 = vpop.f32.mrb[14].mxu0  ;;  %v1238_v36 = vpop.f32.mrb[12].mxu1 }
 0x16b   : > { %v1138_v37 = vpop.f32.mrb[15].mxu0  ;;  %v845_v38 = vpop.f32.mrb[13].mxu1 }
 0x16c   : > { %v822_v39 = vadd.f32 %v1230_v12, %v1136_v34  ;;  %v1139_v40 = vadd.f32 %v1138_v37, %v1137_v35  ;;  %v1239_v41 = vpop.f32.mrb[14].mxu1 }
 0x16d   : > { %v848_v42 = vpop.f32.mrb[15].mxu1 }
 0x16e   : > { %898 = vst [vmem:[%s1770_s17 + $0x30] sm:$0xff] %v822_v39  ;;  %v825_v43 = vadd.f32 %v1231_v17, %v1139_v40 }
 0x170   : > { %899 = vst [vmem:[%s1770_s17 + $0x38] sm:$0xff] %v825_v43  ;;  %v1140_v44 = vpop.f32.mrb[16].mxu0 }
 0x171   : > { %v1141_v45 = vpop.f32.mrb[17].mxu0 }
 0x172   : > { %v1142_v46 = vadd.f32 %v1141_v45, %v1140_v44  ;;  %v1143_v47 = vpop.f32.mrb[18].mxu0  ;;  %v1242_v48 = vpop.f32.mrb[16].mxu1 }
 0x173   : > { %v1144_v49 = vpop.f32.mrb[19].mxu0  ;;  %v861_v50 = vpop.f32.mrb[17].mxu1 }
 0x174   : > { %v1145_v51 = vadd.f32 %v1144_v49, %v1143_v47  ;;  %v830_v52 = vadd.f32 %v1142_v46, %v829_v26  ;;  %v1243_v53 = vpop.f32.mrb[18].mxu1 }
 0x175   : > { %v864_v54 = vpop.f32.mrb[19].mxu1 }
 0x176   : > { %900 = vst [vmem:[%s1770_s17 + $0x40] sm:$0xff] %v830_v52  ;;  %v833_v55 = vadd.f32 %v1145_v51, %v832_v30 }
 0x178   : > { %901 = vst [vmem:[%s1770_s17 + $0x48] sm:$0xff] %v833_v55  ;;  %v1146_v56 = vpop.f32.mrb[20].mxu0 }
 0x179   : > { %v1147_v57 = vpop.f32.mrb[21].mxu0 }
 0x17a   : > { %v1148_v58 = vadd.f32 %v1147_v57, %v1146_v56  ;;  %v1149_v59 = vpop.f32.mrb[22].mxu0  ;;  %v1782_v60 = vpop.f32.mrb[20].mxu1 }
 0x17b   : > { %v1150_v61 = vpop.f32.mrb[23].mxu0  ;;  %v877_v62 = vpop.f32.mrb[21].mxu1 }
 0x17c   : > { %v838_v63 = vadd.f32 %v1234_v24, %v1148_v58  ;;  %v1151_v0 = vadd.f32 %v1150_v61, %v1149_v59  ;;  %v1784_v1 = vpop.f32.mrb[22].mxu1 }
 0x17d   : > { %v880_v2 = vpop.f32.mrb[23].mxu1 }
 0x17e   : > { %902 = vst [vmem:[%s1770_s17 + $0x50] sm:$0xff] %v838_v63  ;;  %v841_v3 = vadd.f32 %v1235_v29, %v1151_v0 }
 0x180   : > { %903 = vst [vmem:[%s1770_s17 + $0x58] sm:$0xff] %v841_v3  ;;  %v1152_v4 = vpop.f32.mrb[24].mxu0 }
 0x181   : > { %v1153_v5 = vpop.f32.mrb[25].mxu0 }
 0x182   : > { %v1154_v6 = vadd.f32 %v1153_v5, %v1152_v4  ;;  %v1155_v7 = vpop.f32.mrb[26].mxu0 }
 0x183   : > { %v1156_v8 = vpop.f32.mrb[27].mxu0 }
 0x184   : > { %v1157_v9 = vadd.f32 %v1156_v8, %v1155_v7  ;;  %v846_v10 = vadd.f32 %v1154_v6, %v845_v38 }
 0x186   : > { %904 = vst [vmem:[%s1770_s17 + $0x60] sm:$0xff] %v846_v10  ;;  %v849_v11 = vadd.f32 %v1157_v9, %v848_v42 }
 0x188   : > { %905 = vst [vmem:[%s1770_s17 + $0x68] sm:$0xff] %v849_v11  ;;  %v1158_v12 = vpop.f32.mrb[28].mxu0 }
 0x189   : > { %v1159_v13 = vpop.f32.mrb[29].mxu0 }
 0x18a   : > { %v1160_v14 = vadd.f32 %v1159_v13, %v1158_v12  ;;  %v1161_v15 = vpop.f32.mrb[30].mxu0 }
 0x18b   : > { %v1162_v16 = vpop.f32.mrb[31].mxu0 }
 0x18c   : > { %v854_v17 = vadd.f32 %v1238_v36, %v1160_v14  ;;  %v1163_v18 = vadd.f32 %v1162_v16, %v1161_v15 }
 0x18e   : > { %906 = vst [vmem:[%s1770_s17 + $0x70] sm:$0xff] %v854_v17  ;;  %v857_v19 = vadd.f32 %v1239_v41, %v1163_v18 }
 0x190   : > { %907 = vst [vmem:[%s1770_s17 + $0x78] sm:$0xff] %v857_v19  ;;  %v1164_v20 = vpop.f32.mrb[32].mxu0 }
 0x191   : > { %v1165_v21 = vpop.f32.mrb[33].mxu0 }
 0x192   : > { %v1166_v22 = vadd.f32 %v1165_v21, %v1164_v20  ;;  %v1167_v23 = vpop.f32.mrb[34].mxu0 }
 0x193   : > { %v1168_v24 = vpop.f32.mrb[35].mxu0 }
 0x194   : > { %v1169_v25 = vadd.f32 %v1168_v24, %v1167_v23  ;;  %v862_v26 = vadd.f32 %v1166_v22, %v861_v50 }
 0x196   : > { %908 = vst [vmem:[%s1770_s17 + $0x80] sm:$0xff] %v862_v26  ;;  %v865_v27 = vadd.f32 %v1169_v25, %v864_v54 }
 0x198   : > { %909 = vst [vmem:[%s1770_s17 + $0x88] sm:$0xff] %v865_v27  ;;  %v1170_v28 = vpop.f32.mrb[36].mxu0 }
 0x199   : > { %v1171_v29 = vpop.f32.mrb[37].mxu0 }
 0x19a   : > { %v1172_v30 = vadd.f32 %v1171_v29, %v1170_v28  ;;  %v1173_v31 = vpop.f32.mrb[38].mxu0 }
 0x19b   : > { %v1174_v32 = vpop.f32.mrb[39].mxu0 }
 0x19c   : > { %v870_v33 = vadd.f32 %v1242_v48, %v1172_v30  ;;  %v1175_v34 = vadd.f32 %v1174_v32, %v1173_v31 }
 0x19e   : > { %910 = vst [vmem:[%s1770_s17 + $0x90] sm:$0xff] %v870_v33  ;;  %v873_v35 = vadd.f32 %v1243_v53, %v1175_v34 }
 0x1a0   : > { %911 = vst [vmem:[%s1770_s17 + $0x98] sm:$0xff] %v873_v35  ;;  %v1176_v36 = vpop.f32.mrb[40].mxu0 }
 0x1a1   : > { %v1177_v37 = vpop.f32.mrb[41].mxu0 }
 0x1a2   : > { %v1178_v38 = vadd.f32 %v1177_v37, %v1176_v36  ;;  %v1179_v39 = vpop.f32.mrb[42].mxu0 }
 0x1a3   : > { %v1180_v40 = vpop.f32.mrb[43].mxu0 }
 0x1a4   : > { %v1181_v41 = vadd.f32 %v1180_v40, %v1179_v39  ;;  %v878_v42 = vadd.f32 %v1178_v38, %v877_v62 }
 0x1a6   : > { %912 = vst [vmem:[%s1770_s17 + $0xa0] sm:$0xff] %v878_v42  ;;  %v881_v43 = vadd.f32 %v1181_v41, %v880_v2 }
 0x1a8   : > { %913 = vst [vmem:[%s1770_s17 + $0xa8] sm:$0xff] %v881_v43  ;;  %v1182_v44 = vpop.f32.mrb[44].mxu0 }
 0x1a9   : > { %v1183_v45 = vpop.f32.mrb[45].mxu0 }
 0x1aa   : > { %v1184_v46 = vadd.f32 %v1183_v45, %v1182_v44  ;;  %v1185_v47 = vpop.f32.mrb[46].mxu0 }
 0x1ab   : > { %v1186_v48 = vpop.f32.mrb[47].mxu0 }
 0x1ac   : > { %v886_v49 = vadd.f32 %v1782_v60, %v1184_v46  ;;  %v1187_v50 = vadd.f32 %v1186_v48, %v1185_v47 }
 0x1ae   : > { %914 = vst [vmem:[%s1770_s17 + $0xb0] sm:$0xff] %v886_v49  ;;  %v889_v51 = vadd.f32 %v1784_v1, %v1187_v50 }
 0x1b0   : > { %915 = vst [vmem:[%s1770_s17 + $0xb8] sm:$0xff] %v889_v51 }
 0x1b1   : > { %1474 = shalt.err (!%p1471_p6)
}
 0x1b2   : > { %s1475_s5 = scalar_lea.hbm %s1804_s8, 3072  ;;  %s1479_s16 = scalar_lea.hbm %s1860_s2, 6144 }
 0x1b3   : > { %p1476_p0 = scmp.ne.s32.totalorder %s1804_s8, %s1475_s5  ;;  %p1480_p12 = scmp.lt.u32.totalorder %s1804_s8, %s1860_s2 }
 0x1b4   : > { %p1481_p5 = scmp.lt.u32.totalorder %s1479_s16, %s1475_s5  ;;  %p1483_p9 = scmp.lt.u32.totalorder %s1475_s5, %s1804_s8 }
 0x1b5   : > { %p1477_p2 = pnand %p1476_p0, %p1879_p11 }
 0x1b6   : > { %p1482_p8 = por %p1481_p5, %p1480_p12 }
 0x1b7   : > { %p1478_p7 = pneg %p1477_p2 }
 0x1b8   : > { %p1484_p13 = por %p1483_p9, %p1482_p8 }
 0x1ba   : > { %p1485_p4 = pnand %p1484_p13, %p1478_p7 }
 0x1bc   : > { %1488 = shalt.err (!%p1485_p4)
}
 0x1bd   : > { %s1557_s26 = smov 128   ;;  %s1558_s17 = smov 256  }
 0x1be   : > { %s1559_s19 = smov 8  }
 0x1bf   : > { %1256 = dma.vmem_to_hbm [thread:$0]  (%p1879_p11), %s1806_s22, 3072, %s1804_s8, %s917_s12, %s1557_s26, %s1558_s17, %s1559_s19  }
 0x1c0 PF: > { %s947_s25 = sand.u32 1, %s1527_s9   ;;  %p1880_p1 = scmp.ne.s32.totalorder %s1871_s21, 0 }
 0x1c1   : > { %p1881_p10 = scmp.ge.s32.totalorder %s1547_s14, 2  ;;  %s948_s6 = scalar_lea.sflag [#allocation4], %s947_s25 }
 0x1c3   : > { %p1267_p3 = pnand %p1881_p10, %p1880_p1 }
 0x1c5   : > { %1522 = dma.done.wait (!%p1267_p3), %s948_s6, 3072  }
 0x1c6   : > { %1524 = vsyncadd (!%p1267_p3), %s948_s6, 4294964224  ;;  %s19_s14 = sadd.s32 1, %s1547_s14   ;;  %s1882_s9 = smov %s1531_s10 }
 0x1c7   : > { %p16_p6 = scmp.ge.s32.totalorder %s19_s14, 4   ;;  %s1883_s10 = smov %s1535_s11 }
 0x1c8   : > { %s1884_s11 = smov %s1693_s7  ;;  %s1885_s12 = smov %s1543_s13 }
 0x1c9   : > { %s1886_s13 = smov %s1888_s27  ;;  %18 = sbr.rel (!%p16_p6) target bundleno = 7 (0x7), region = 79 }
 0x1d0   :  { %953 = vsyncpa [#allocation3], 1 }
 0x1d1   :  { %955 = vsyncpa [#allocation3 + $0x1], 1 }
 0x1d2   :  { %956 = vsyncpa [#allocation6], 1 }
 0x1d3   :  { %958 = vsyncpa [#allocation6 + $0x1], 1 }
 0x1d4   :  { %959 = vsyncpa [#allocation4], 1 }
 0x1d5   :  { %961 = vsyncpa [#allocation4 + $0x1], 1 }

</bundles_post_ra>
